<compile_context>
chip_gen: v5e
topology: v5e:2x2
jax: 0.10.0
libtpu: 0.0.40
codegen_flags: <defaults>
</compile_context>

<pallas_src>
import jax
import jax.numpy as jnp
from jax.experimental import pallas as pl
from jax.experimental.pallas import tpu as pltpu

NUM_CLASSES = 10
H1, H2 = 200, 100                   # logical widths (PyTorch module)
H1_P, H2_P, OUT_P = 256, 128, 128   # lane-padded widths (multiples of 128)
NEG_SLOPE = 0.01                    # F.leaky_relu default


def _round_up(x, m):
    return ((x + m - 1) // m) * m


def _leaky_relu(x):
    return jnp.where(x > 0, x, NEG_SLOPE * x)


def nn4b_kernel(x_ref, w1_ref, b1_ref, w2_ref, b2_ref, w3_ref, b3_ref, out_ref):
    # One (TB, D) batch tile of f32 activations; weights are VMEM-resident.
    # f32 -> bf16 cast happens here (VPU work, hidden under the input DMA).
    x = x_ref[...].astype(jnp.bfloat16)
    h1 = jnp.dot(x, w1_ref[...], preferred_element_type=jnp.float32) + b1_ref[...]
    h1 = _leaky_relu(h1).astype(jnp.bfloat16)                       # f32 acc -> bf16 feed
    h2 = jnp.dot(h1, w2_ref[...], preferred_element_type=jnp.float32) + b2_ref[...]
    h2 = _leaky_relu(h2).astype(jnp.bfloat16)
    out = jnp.dot(h2, w3_ref[...], preferred_element_type=jnp.float32) + b3_ref[...]
    out_ref[...] = out.astype(out_ref.dtype)                        # lane-dense 128-wide store


def nn4b_forward(x_nchw, params, *, tb=1024):
    """x_nchw: (B, C, H, W) float32. params: padded bf16 weights / f32 biases.
    Returns logits (B, NUM_CLASSES) float32."""
    w1, b1, w2, b2, w3, b3 = params
    B = x_nchw.shape[0]

    # nn.Flatten(start_dim=1): pure reshape, no HBM copy, stays f32.
    x_flat = x_nchw.reshape(B, -1)
    D = x_flat.shape[1]
    assert w1.shape[0] == D, "param feature dim must match flattened input"

    # Batch tile: sublane-aligned (mult of 16); capped near B/2 so large batches
    # give >=2 tiles (both v7x TensorCores).  No batch padding: partial last
    # tile is allowed, OOB input rows are garbage but their outputs are dropped.
    TB = min(tb, _round_up(pl.cdiv(B, 2), 16))
    grid = (pl.cdiv(B, TB),)

    resident = lambda i: (0, 0)  # constant index_map -> fetched once, stays in VMEM

    w_bytes = (D * H1_P + H1_P * H2_P + H2_P * OUT_P) * 2 + (H1_P + H2_P + OUT_P) * 4
    cost = pl.CostEstimate(
        flops=2 * B * (D * H1_P + H1_P * H2_P + H2_P * OUT_P),
        transcendentals=0,
        bytes_accessed=B * D * 4 + B * OUT_P * 4 + w_bytes,
    )

    logits_p = pl.pallas_call(
        nn4b_kernel,
        out_shape=jax.ShapeDtypeStruct((B, OUT_P), jnp.float32),
        grid=grid,
        in_specs=[
            pl.BlockSpec((TB, D), lambda i: (i, 0)),   # streamed f32 batch tile
            pl.BlockSpec((D, H1_P), resident),
            pl.BlockSpec((1, H1_P), resident),
            pl.BlockSpec((H1_P, H2_P), resident),
            pl.BlockSpec((1, H2_P), resident),
            pl.BlockSpec((H2_P, OUT_P), resident),
            pl.BlockSpec((1, OUT_P), resident),
        ],
        out_specs=pl.BlockSpec((TB, OUT_P), lambda i: (i, 0)),
        compiler_params=pltpu.CompilerParams(
            dimension_semantics=("parallel",),       # shard batch tiles across TCs (v7x)
            vmem_limit_bytes=32 * 1024 * 1024,       # headroom for TB=1024 f32 tiles on v5e
        ),
        cost_estimate=cost,
    )(x_flat, w1, b1, w2, b2, w3, b3)

    return logits_p[:, :NUM_CLASSES]


def init_params(key, input_size):
    """PyTorch-Linear-style init (uniform +-1/sqrt(fan_in)), weights stored (in, out).
    Returns (lane-padded bf16/f32 params for the kernel, unpadded f32 params for reference)."""
    ks = jax.random.split(key, 6)

    def lin(kw, kb, fan_in, fan_out, fan_in_p, fan_out_p):
        bound = 1.0 / (float(fan_in) ** 0.5)
        w = jax.random.uniform(kw, (fan_in, fan_out), jnp.float32, -bound, bound)
        b = jax.random.uniform(kb, (1, fan_out), jnp.float32, -bound, bound)
        w_p = jnp.zeros((fan_in_p, fan_out_p), jnp.float32).at[:fan_in, :fan_out].set(w)
        b_p = jnp.zeros((1, fan_out_p), jnp.float32).at[:, :fan_out].set(b)
        return w_p.astype(jnp.bfloat16), b_p, w, b

    # fc1 input dim is NOT padded (x is fed unpadded); hidden dims are lane-padded.
    w1p, b1p, w1, b1 = lin(ks[0], ks[1], input_size, H1, input_size, H1_P)
    w2p, b2p, w2, b2 = lin(ks[2], ks[3], H1, H2, H1_P, H2_P)
    w3p, b3p, w3, b3 = lin(ks[4], ks[5], H2, NUM_CLASSES, H2_P, OUT_P)

    params_pad = (w1p, b1p, w2p, b2p, w3p, b3p)
    params_ref = (w1, b1, w2, b2, w3, b3)
    return params_pad, params_ref


def reference_forward(x_nchw, params_ref):
    """JAX reference mirroring the kernel's numerics (bf16 operands, f32 accumulation)."""
    w1, b1, w2, b2, w3, b3 = params_ref
    x = x_nchw.reshape(x_nchw.shape[0], -1).astype(jnp.bfloat16)
    h1 = jnp.dot(x, w1.astype(jnp.bfloat16), preferred_element_type=jnp.float32) + b1
    h1 = _leaky_relu(h1).astype(jnp.bfloat16)
    h2 = jnp.dot(h1, w2.astype(jnp.bfloat16), preferred_element_type=jnp.float32) + b2
    h2 = _leaky_relu(h2).astype(jnp.bfloat16)
    return jnp.dot(h2, w3.astype(jnp.bfloat16), preferred_element_type=jnp.float32) + b3


if __name__ == "__main__":
    key = jax.random.PRNGKey(0)
    k_x, k_p = jax.random.split(key)

    # Small NCHW input consistent with the flatten-based MLP.
    B, C, Hh, Ww = 2, 4, 16, 16
    input_size = C * Hh * Ww
    x = jax.random.normal(k_x, (B, C, Hh, Ww), dtype=jnp.float32)

    params_pad, params_ref = init_params(k_p, input_size)

    out = jax.block_until_ready(nn4b_forward(x, params_pad))
    ref = reference_forward(x, params_ref)

    assert out.shape == (B, NUM_CLASSES)
    assert jnp.allclose(out, ref, atol=1e-2, rtol=1e-2), "mismatch vs JAX reference"

    print("KERNEL_OK")
</pallas_src>

<mosaic_0001>
module attributes {stable_mosaic.version = 11 : i64} {
  func.func @nn4b_kernel(%arg0: i32, %arg1: memref<16x1024xf32, #tpu.memory_space<vmem>>, %arg2: memref<1024x256xbf16, #tpu.memory_space<vmem>>, %arg3: memref<1x256xf32, #tpu.memory_space<vmem>>, %arg4: memref<256x128xbf16, #tpu.memory_space<vmem>>, %arg5: memref<1x128xf32, #tpu.memory_space<vmem>>, %arg6: memref<128x128xbf16, #tpu.memory_space<vmem>>, %arg7: memref<1x128xf32, #tpu.memory_space<vmem>>, %arg8: memref<16x128xf32, #tpu.memory_space<vmem>>) attributes {dimension_semantics = [#tpu.dimension_semantics<parallel>], iteration_bounds = array<i64: 1>, scalar_prefetch = 0 : i64, scratch_operands = 0 : i64, tpu.core_type = #tpu.core_type<tc>, window_params = [{transform_indices = @transform_0, window_bounds = array<i64: 16, 1024>}, {pipeline_mode = #tpu.pipeline_mode<synchronous>, transform_indices = @transform_1, window_bounds = array<i64: 1024, 256>}, {pipeline_mode = #tpu.pipeline_mode<synchronous>, transform_indices = @transform_2, window_bounds = array<i64: 1, 256>}, {pipeline_mode = #tpu.pipeline_mode<synchronous>, transform_indices = @transform_3, window_bounds = array<i64: 256, 128>}, {pipeline_mode = #tpu.pipeline_mode<synchronous>, transform_indices = @transform_4, window_bounds = array<i64: 1, 128>}, {pipeline_mode = #tpu.pipeline_mode<synchronous>, transform_indices = @transform_5, window_bounds = array<i64: 128, 128>}, {pipeline_mode = #tpu.pipeline_mode<synchronous>, transform_indices = @transform_6, window_bounds = array<i64: 1, 128>}, {transform_indices = @transform_7, window_bounds = array<i64: 16, 128>}]} {
    %c0 = arith.constant 0 : index
    %c0_0 = arith.constant 0 : index
    %0 = vector.load %arg1[%c0, %c0_0] : memref<16x1024xf32, #tpu.memory_space<vmem>>, vector<16x1024xf32>
    %1 = arith.truncf %0 : vector<16x1024xf32> to vector<16x1024xbf16>
    %c0_1 = arith.constant 0 : index
    %c0_2 = arith.constant 0 : index
    %2 = vector.load %arg2[%c0_1, %c0_2] : memref<1024x256xbf16, #tpu.memory_space<vmem>>, vector<1024x256xbf16>
    %cst = arith.constant dense<0.000000e+00> : vector<16x256xf32>
    %3 = tpu.matmul %1, %2, %cst {dimension_numbers = #tpu.dot_dimension_numbers<[1], [0], [0], [1], [0, 0, 1, 1], [], []>} : vector<16x1024xbf16>, vector<1024x256xbf16>, vector<16x256xf32> -> vector<16x256xf32>
    %c0_3 = arith.constant 0 : index
    %c0_4 = arith.constant 0 : index
    %4 = vector.load %arg3[%c0_3, %c0_4] : memref<1x256xf32, #tpu.memory_space<vmem>>, vector<1x256xf32>
    %5 = vector.broadcast %4 : vector<1x256xf32> to vector<16x256xf32>
    %6 = arith.addf %3, %5 : vector<16x256xf32>
    %cst_5 = arith.constant 0.000000e+00 : f32
    %7 = vector.broadcast %cst_5 : f32 to vector<16x256xf32>
    %8 = arith.cmpf ogt, %6, %7 : vector<16x256xf32>
    %cst_6 = arith.constant 0.00999999977 : f32
    %9 = vector.broadcast %cst_6 : f32 to vector<16x256xf32>
    %10 = arith.mulf %9, %6 : vector<16x256xf32>
    %11 = arith.select %8, %6, %10 : vector<16x256xi1>, vector<16x256xf32>
    %12 = arith.truncf %11 : vector<16x256xf32> to vector<16x256xbf16>
    %c0_7 = arith.constant 0 : index
    %c0_8 = arith.constant 0 : index
    %13 = vector.load %arg4[%c0_7, %c0_8] : memref<256x128xbf16, #tpu.memory_space<vmem>>, vector<256x128xbf16>
    %cst_9 = arith.constant dense<0.000000e+00> : vector<16x128xf32>
    %14 = tpu.matmul %12, %13, %cst_9 {dimension_numbers = #tpu.dot_dimension_numbers<[1], [0], [0], [1], [0, 0, 1, 1], [], []>} : vector<16x256xbf16>, vector<256x128xbf16>, vector<16x128xf32> -> vector<16x128xf32>
    %c0_10 = arith.constant 0 : index
    %c0_11 = arith.constant 0 : index
    %15 = vector.load %arg5[%c0_10, %c0_11] : memref<1x128xf32, #tpu.memory_space<vmem>>, vector<1x128xf32>
    %16 = vector.broadcast %15 : vector<1x128xf32> to vector<16x128xf32>
    %17 = arith.addf %14, %16 : vector<16x128xf32>
    %cst_12 = arith.constant 0.000000e+00 : f32
    %18 = vector.broadcast %cst_12 : f32 to vector<16x128xf32>
    %19 = arith.cmpf ogt, %17, %18 : vector<16x128xf32>
    %cst_13 = arith.constant 0.00999999977 : f32
    %20 = vector.broadcast %cst_13 : f32 to vector<16x128xf32>
    %21 = arith.mulf %20, %17 : vector<16x128xf32>
    %22 = arith.select %19, %17, %21 : vector<16x128xi1>, vector<16x128xf32>
    %23 = arith.truncf %22 : vector<16x128xf32> to vector<16x128xbf16>
    %c0_14 = arith.constant 0 : index
    %c0_15 = arith.constant 0 : index
    %24 = vector.load %arg6[%c0_14, %c0_15] : memref<128x128xbf16, #tpu.memory_space<vmem>>, vector<128x128xbf16>
    %cst_16 = arith.constant dense<0.000000e+00> : vector<16x128xf32>
    %25 = tpu.matmul %23, %24, %cst_16 {dimension_numbers = #tpu.dot_dimension_numbers<[1], [0], [0], [1], [0, 0, 1, 1], [], []>} : vector<16x128xbf16>, vector<128x128xbf16>, vector<16x128xf32> -> vector<16x128xf32>
    %c0_17 = arith.constant 0 : index
    %c0_18 = arith.constant 0 : index
    %26 = vector.load %arg7[%c0_17, %c0_18] : memref<1x128xf32, #tpu.memory_space<vmem>>, vector<1x128xf32>
    %27 = vector.broadcast %26 : vector<1x128xf32> to vector<16x128xf32>
    %28 = arith.addf %25, %27 : vector<16x128xf32>
    %c0_19 = arith.constant 0 : index
    %c0_20 = arith.constant 0 : index
    %29 = vector.load %arg8[%c0_19, %c0_20] : memref<16x128xf32, #tpu.memory_space<vmem>>, vector<16x128xf32>
    tpu.vector_store %arg8[%c0_19, %c0_20], %28 {strides = array<i32>} : memref<16x128xf32, #tpu.memory_space<vmem>>, vector<16x128xf32>,
    return
  }
  func.func @transform_0(%arg0: i32) -> (i32, i32) {
    %c0_i32 = arith.constant 0 : i32
    %c0_i32_0 = arith.constant 0 : i32
    return %arg0, %c0_i32 : i32, i32
  }
  func.func @transform_1(%arg0: i32) -> (i32, i32) {
    %c0_i32 = arith.constant 0 : i32
    %c0_i32_0 = arith.constant 0 : i32
    %c0_i32_1 = arith.constant 0 : i32
    return %c0_i32, %c0_i32_0 : i32, i32
  }
  func.func @transform_2(%arg0: i32) -> (i32, i32) {
    %c0_i32 = arith.constant 0 : i32
    %c0_i32_0 = arith.constant 0 : i32
    %c0_i32_1 = arith.constant 0 : i32
    return %c0_i32, %c0_i32_0 : i32, i32
  }
  func.func @transform_3(%arg0: i32) -> (i32, i32) {
    %c0_i32 = arith.constant 0 : i32
    %c0_i32_0 = arith.constant 0 : i32
    %c0_i32_1 = arith.constant 0 : i32
    return %c0_i32, %c0_i32_0 : i32, i32
  }
  func.func @transform_4(%arg0: i32) -> (i32, i32) {
    %c0_i32 = arith.constant 0 : i32
    %c0_i32_0 = arith.constant 0 : i32
    %c0_i32_1 = arith.constant 0 : i32
    return %c0_i32, %c0_i32_0 : i32, i32
  }
  func.func @transform_5(%arg0: i32) -> (i32, i32) {
    %c0_i32 = arith.constant 0 : i32
    %c0_i32_0 = arith.constant 0 : i32
    %c0_i32_1 = arith.constant 0 : i32
    return %c0_i32, %c0_i32_0 : i32, i32
  }
  func.func @transform_6(%arg0: i32) -> (i32, i32) {
    %c0_i32 = arith.constant 0 : i32
    %c0_i32_0 = arith.constant 0 : i32
    %c0_i32_1 = arith.constant 0 : i32
    return %c0_i32, %c0_i32_0 : i32, i32
  }
  func.func @transform_7(%arg0: i32) -> (i32, i32) {
    %c0_i32 = arith.constant 0 : i32
    %c0_i32_0 = arith.constant 0 : i32
    return %arg0, %c0_i32 : i32, i32
  }
}

</mosaic_0001>

<bundles_post_ra>
// kernel: tpu_custom_call.1
= control target key start
LH: loop header
LB: loop body
LE: loop exit
PB: predicated region body
PF: predicated region fallthrough
CT: control target
= control target key end

     0   :  { %12 = vsyncpa [#allocation3], 0  ;;  %s2533_s0 = inlined_call_operand.hbm [shape: f32[2,1024], index: 0, kind: input, shape index: {}]   ;;  %s2534_s1 = inlined_call_operand.hbm [shape: bf16[1024,256], index: 1, kind: input, shape index: {}]   ;;  %s2535_s2 = inlined_call_operand.hbm [shape: f32[1,256], index: 2, kind: input, shape index: {}]   ;;  %s2536_s3 = inlined_call_operand.hbm [shape: bf16[256,128], index: 3, kind: input, shape index: {}]   ;;  %s2537_s4 = inlined_call_operand.vmem [shape: f32[1,128], index: 4, kind: input, shape index: {}]   ;;  %s2538_s5 = inlined_call_operand.hbm [shape: bf16[128,128], index: 5, kind: input, shape index: {}]   ;;  %s2539_s6 = inlined_call_operand.vmem [shape: f32[1,128], index: 6, kind: input, shape index: {}]   ;;  %s2540_s7 = inlined_call_operand.hbm [shape: f32[2,128], index: 7, kind: output, shape index: {}]  }
   0x1   :  { %13 = vsyncpa [#allocation6], 0 }
   0x2   :  { %14 = vsyncpa [#allocation9], 0 }
   0x3   :  { %15 = vsyncpa [#allocation4], 0  ;;  %s33_s26 = sshll.u32 %s2534_s1, 4  ;;  %s34_s26 = int_to_ptr.hbm [resolvable:$true] %s33_s26 }
   0x4   :  { %19 = vsyncadd [#allocation3], 1792  ;;  %s2410_s27 = smov [#allocation5]   ;;  %s57_s8 = sshll.u32 %s2536_s3, 4  ;;  %s58_s8 = int_to_ptr.hbm [resolvable:$true] %s57_s8 }
   0x5   :  { %s35_s28 = sshll.u32 %s2410_s27, 4  ;;  %s2411_s9 = smov 128   ;;  %s36_s28 = int_to_ptr.vmem [resolvable:$true] %s35_s28 }
   0x6   :  { %s2412_s10 = smov 8   ;;  %s2413_s11 = smov [#allocation8]  }
   0x7   :  { %41 = dma.hbm_to_vmem [thread:$0]  %s34_s26, 16384, %s36_s28, [#allocation6], %s2411_s9, %s2411_s9, %s2412_s10  }
   0x8   :  { %s59_s12 = sshll.u32 %s2413_s11, 4  ;;  %s2414_s13 = smov 64   ;;  %s60_s12 = int_to_ptr.vmem [resolvable:$true] %s59_s12 }
   0x9   :  { %s2415_s14 = smov 4   ;;  %s20_s16 = sshll.u32 %s2533_s0, 4  ;;  %s21_s16 = int_to_ptr.hbm [resolvable:$true] %s20_s16 }
   0xa   :  { %65 = dma.hbm_to_vmem [thread:$0]  %s58_s8, 2048, %s60_s12, [#allocation9], %s2414_s13, %s2414_s13, %s2415_s14  }
   0xb   :  { %s2416_s17 = smov [#allocation2]   ;;  %s47_s20 = sshll.u32 %s2535_s2, 4  ;;  %s48_s20 = int_to_ptr.hbm [resolvable:$true] %s47_s20 }
   0xc   :  { %s22_s18 = sshll.u32 %s2416_s17, 4  ;;  %s2417_s21 = smov 256   ;;  %s23_s18 = int_to_ptr.vmem [resolvable:$true] %s22_s18 }
   0xd   :  { %s2418_s22 = smov 16   ;;  %s2419_s23 = smov [#allocation7]  }
   0xe   :  { %28 = dma.hbm_to_vmem [thread:$0]  %s21_s16, 256, %s23_s18, [#allocation3], %s2417_s21, %s2417_s21, %s2418_s22  }
   0xf   :  { %s49_s24 = sshll.u32 %s2419_s23, 4  ;;  %s72_s27 = sshll.u32 %s2538_s5, 4  ;;  %s50_s24 = int_to_ptr.vmem [resolvable:$true] %s49_s24  ;;  %s73_s27 = int_to_ptr.hbm [resolvable:$true] %s72_s27 }
  0x10   :  { %52 = dma.hbm_to_vmem [thread:$0]  %s48_s20, 32, %s50_s24, [#allocation6]  }
  0x11   :  { %s2420_s0 = smov [#allocation10]  }
  0x12   :  { %s74_s28 = sshll.u32 %s2420_s0, 4  ;;  %s75_s28 = int_to_ptr.vmem [resolvable:$true] %s74_s28 }
  0x13   :  { %80 = dma.hbm_to_vmem [thread:$0]  %s73_s27, 1024, %s75_s28, [#allocation9], %s2414_s13, %s2414_s13, %s2415_s14  }
  0x14   :  { %2402 = dma.done.wait [#allocation3], 2048  }
  0x15   :  { %2403 = vsyncadd [#allocation3], 4294965248 }
  0x16   :  { %2404 = dma.done.wait [#allocation6], 16416  }
  0x17   :  { %2405 = vsyncadd [#allocation6], 4294950880 }
  0x18   :  { %2406 = dma.done.wait [#allocation9], 3072  }
  0x19   :  { %2407 = vsyncadd [#allocation9], 4294964224  ;;  %v1540_v0 = vld [vmem:[#allocation5 + $0x70] sm:$0xf]  ;;  %v2105_v1 = vld [vmem:[#allocation5 + $0x74] sm:$0xf0] }
  0x1a   :  { %v1604_v2 = vld [vmem:[#allocation5 + $0xf0] sm:$0xf]  ;;  %v1541_v3 = vor.u32 %v2105_v1, %v1540_v0  ;;  %v2121_v4 = vld [vmem:[#allocation5 + $0xf4] sm:$0xf0]  ;;  %v1532_v11 = vld [vmem:[#allocation5 + $0x60] sm:$0xf] }
  0x1b   :  { %v1668_v5 = vld [vmem:[#allocation5 + $0x170] sm:$0xf]  ;;  %v2137_v6 = vld [vmem:[#allocation5 + $0x174] sm:$0xf0]  ;;  %v1605_v7 = vor.u32 %v2121_v4, %v1604_v2  ;;  %v2103_v13 = vld [vmem:[#allocation5 + $0x64] sm:$0xf0] }
  0x1c   :  { %v1669_v8 = vor.u32 %v2137_v6, %v1668_v5  ;;  %v1732_v9 = vld [vmem:[#allocation5 + $0x1f0] sm:$0xf]  ;;  %v2153_v10 = vld [vmem:[#allocation5 + $0x1f4] sm:$0xf0]  ;;  %972 = vmatpush.bf16.msra.mxu0 %v1541_v3  ;;  %v1596_v14 = vld [vmem:[#allocation5 + $0xe0] sm:$0xf]  ;;  %v1533_v16 = vor.u32 %v2103_v13, %v1532_v11 }
  0x1d   :  { %v1733_v12 = vor.u32 %v2153_v10, %v1732_v9  ;;  %v2119_v15 = vld [vmem:[#allocation5 + $0xe4] sm:$0xf0]  ;;  %986 = vmatpush.bf16.msra.mxu1 %v1605_v7  ;;  %v1660_v18 = vld [vmem:[#allocation5 + $0x160] sm:$0xf]  ;;  %v1524_v23 = vld [vmem:[#allocation5 + $0x50] sm:$0xf] }
  0x1e   :  { %1000 = vmatpush.bf16.msra.mxu2 %v1669_v8  ;;  %v1597_v17 = vor.u32 %v2119_v15, %v1596_v14  ;;  %v2135_v19 = vld [vmem:[#allocation5 + $0x164] sm:$0xf0]  ;;  %v1724_v20 = vld [vmem:[#allocation5 + $0x1e0] sm:$0xf]  ;;  %v2101_v24 = vld [vmem:[#allocation5 + $0x54] sm:$0xf0] }
  0x1f   :  { %1014 = vmatpush.bf16.msra.mxu3 %v1733_v12  ;;  %v1661_v21 = vor.u32 %v2135_v19, %v1660_v18  ;;  %v2151_v22 = vld [vmem:[#allocation5 + $0x1e4] sm:$0xf0]  ;;  %v1588_v26 = vld [vmem:[#allocation5 + $0xd0] sm:$0xf]  ;;  %v2117_v27 = vld [vmem:[#allocation5 + $0xd4] sm:$0xf0]  ;;  %v1525_v29 = vor.u32 %v2101_v24, %v1524_v23 }
  0x20   :  { %v1725_v25 = vor.u32 %v2151_v22, %v1724_v20  ;;  %v1652_v28 = vld [vmem:[#allocation5 + $0x150] sm:$0xf]  ;;  %973 = vmatpush.bf16.msra.mxu0 %v1533_v16  ;;  %v2133_v30 = vld [vmem:[#allocation5 + $0x154] sm:$0xf0]  ;;  %v1589_v33 = vor.u32 %v2117_v27, %v1588_v26  ;;  %v1516_v35 = vld [vmem:[#allocation5 + $0x40] sm:$0xf] }
  0x21   :  { %v1716_v31 = vld [vmem:[#allocation5 + $0x1d0] sm:$0xf]  ;;  %v2149_v32 = vld [vmem:[#allocation5 + $0x1d4] sm:$0xf0]  ;;  %987 = vmatpush.bf16.msra.mxu1 %v1597_v17  ;;  %v1653_v34 = vor.u32 %v2133_v30, %v1652_v28  ;;  %v2099_v36 = vld [vmem:[#allocation5 + $0x44] sm:$0xf0] }
  0x22   :  { %1001 = vmatpush.bf16.msra.mxu2 %v1661_v21  ;;  %v1580_v37 = vld [vmem:[#allocation5 + $0xc0] sm:$0xf]  ;;  %v1717_v38 = vor.u32 %v2149_v32, %v1716_v31  ;;  %v2115_v39 = vld [vmem:[#allocation5 + $0xc4] sm:$0xf0]  ;;  %v1517_v44 = vor.u32 %v2099_v36, %v1516_v35  ;;  %v1508_v47 = vld [vmem:[#allocation5 + $0x30] sm:$0xf] }
  0x23   :  { %1015 = vmatpush.bf16.msra.mxu3 %v1725_v25  ;;  %v1644_v40 = vld [vmem:[#allocation5 + $0x140] sm:$0xf]  ;;  %v2131_v41 = vld [vmem:[#allocation5 + $0x144] sm:$0xf0]  ;;  %v1581_v45 = vor.u32 %v2115_v39, %v1580_v37  ;;  %v2097_v48 = vld [vmem:[#allocation5 + $0x34] sm:$0xf0] }
  0x24   :  { %v1708_v42 = vld [vmem:[#allocation5 + $0x1c0] sm:$0xf]  ;;  %v2147_v43 = vld [vmem:[#allocation5 + $0x1c4] sm:$0xf0]  ;;  %974 = vmatpush.bf16.msra.mxu0 %v1525_v29  ;;  %v1645_v46 = vor.u32 %v2131_v41, %v1644_v40  ;;  %v1572_v49 = vld [vmem:[#allocation5 + $0xb0] sm:$0xf]  ;;  %v1509_v56 = vor.u32 %v2097_v48, %v1508_v47 }
  0x25   :  { %988 = vmatpush.bf16.msra.mxu1 %v1589_v33  ;;  %v1709_v50 = vor.u32 %v2147_v43, %v1708_v42  ;;  %v2113_v51 = vld [vmem:[#allocation5 + $0xb4] sm:$0xf0]  ;;  %v1636_v52 = vld [vmem:[#allocation5 + $0x130] sm:$0xf]  ;;  %v1500_v59 = vld [vmem:[#allocation5 + $0x20] sm:$0xf] }
  0x26   :  { %1002 = vmatpush.bf16.msra.mxu2 %v1653_v34  ;;  %v2129_v53 = vld [vmem:[#allocation5 + $0x134] sm:$0xf0]  ;;  %v1700_v54 = vld [vmem:[#allocation5 + $0x1b0] sm:$0xf]  ;;  %v1573_v57 = vor.u32 %v2113_v51, %v1572_v49  ;;  %v2095_v60 = vld [vmem:[#allocation5 + $0x24] sm:$0xf0] }
  0x27   :  { %1016 = vmatpush.bf16.msra.mxu3 %v1717_v38  ;;  %v2145_v55 = vld [vmem:[#allocation5 + $0x1b4] sm:$0xf0]  ;;  %v1637_v58 = vor.u32 %v2129_v53, %v1636_v52  ;;  %v1564_v61 = vld [vmem:[#allocation5 + $0xa0] sm:$0xf]  ;;  %v2111_v63 = vld [vmem:[#allocation5 + $0xa4] sm:$0xf0]  ;;  %v1501_v4 = vor.u32 %v2095_v60, %v1500_v59 }
  0x28   :  { %975 = vmatpush.bf16.msra.mxu0 %v1517_v44  ;;  %v1701_v62 = vor.u32 %v2145_v55, %v1700_v54  ;;  %v1628_v0 = vld [vmem:[#allocation5 + $0x120] sm:$0xf]  ;;  %v2127_v1 = vld [vmem:[#allocation5 + $0x124] sm:$0xf0]  ;;  %v1565_v5 = vor.u32 %v2111_v63, %v1564_v61  ;;  %v1492_v7 = vld [vmem:[#allocation5 + $0x10] sm:$0xf] }
  0x29   :  { %989 = vmatpush.bf16.msra.mxu1 %v1581_v45  ;;  %v1692_v2 = vld [vmem:[#allocation5 + $0x1a0] sm:$0xf]  ;;  %v2143_v3 = vld [vmem:[#allocation5 + $0x1a4] sm:$0xf0]  ;;  %v1629_v6 = vor.u32 %v2127_v1, %v1628_v0  ;;  %v2093_v8 = vld [vmem:[#allocation5 + $0x14] sm:$0xf0] }
  0x2a   :  { %1003 = vmatpush.bf16.msra.mxu2 %v1645_v46  ;;  %v1556_v9 = vld [vmem:[#allocation5 + $0x90] sm:$0xf]  ;;  %v1693_v10 = vor.u32 %v2143_v3, %v1692_v2  ;;  %v2109_v11 = vld [vmem:[#allocation5 + $0x94] sm:$0xf0]  ;;  %v1493_v16 = vor.u32 %v2093_v8, %v1492_v7  ;;  %v1484_v17 = vld [vmem:[#allocation5] sm:$0xf] }
  0x2b   :  { %1017 = vmatpush.bf16.msra.mxu3 %v1709_v50  ;;  %v1620_v12 = vld [vmem:[#allocation5 + $0x110] sm:$0xf]  ;;  %v2125_v13 = vld [vmem:[#allocation5 + $0x114] sm:$0xf0]  ;;  %v2091_v18 = vld [vmem:[#allocation5 + $0x4] sm:$0xf0]  ;;  %v1557_v19 = vor.u32 %v2109_v11, %v1556_v9 }
  0x2c   :  { %976 = vmatpush.bf16.msra.mxu0 %v1509_v56  ;;  %v1684_v14 = vld [vmem:[#allocation5 + $0x190] sm:$0xf]  ;;  %v2141_v15 = vld [vmem:[#allocation5 + $0x194] sm:$0xf0]  ;;  %v1621_v20 = vor.u32 %v2125_v13, %v1620_v12  ;;  %v1548_v21 = vld [vmem:[#allocation5 + $0x80] sm:$0xf]  ;;  %v1485_v31 = vor.u32 %v2091_v18, %v1484_v17 }
  0x2d   :  { %990 = vmatpush.bf16.msra.mxu1 %v1573_v57  ;;  %v2107_v22 = vld [vmem:[#allocation5 + $0x84] sm:$0xf0]  ;;  %v1612_v23 = vld [vmem:[#allocation5 + $0x100] sm:$0xf]  ;;  %v1685_v24 = vor.u32 %v2141_v15, %v1684_v14  ;;  %v1796_v28 = vld [vmem:[#allocation5 + $0x270] sm:$0xf] }
  0x2e   :  { %1004 = vmatpush.bf16.msra.mxu2 %v1637_v58  ;;  %v2123_v25 = vld [vmem:[#allocation5 + $0x104] sm:$0xf0]  ;;  %v1676_v26 = vld [vmem:[#allocation5 + $0x180] sm:$0xf]  ;;  %v2169_v29 = vld [vmem:[#allocation5 + $0x274] sm:$0xf0]  ;;  %v1549_v35 = vor.u32 %v2107_v22, %v1548_v21 }
  0x2f   :  { %1018 = vmatpush.bf16.msra.mxu3 %v1701_v62  ;;  %v2139_v27 = vld [vmem:[#allocation5 + $0x184] sm:$0xf0]  ;;  %v1860_v30 = vld [vmem:[#allocation5 + $0x2f0] sm:$0xf]  ;;  %v2185_v32 = vld [vmem:[#allocation5 + $0x2f4] sm:$0xf0]  ;;  %v1613_v36 = vor.u32 %v2123_v25, %v1612_v23  ;;  %v1797_v40 = vor.u32 %v2169_v29, %v1796_v28 }
  0x30   :  { %977 = vmatpush.bf16.msra.mxu0 %v1501_v4  ;;  %v1924_v33 = vld [vmem:[#allocation5 + $0x370] sm:$0xf]  ;;  %v2201_v34 = vld [vmem:[#allocation5 + $0x374] sm:$0xf0]  ;;  %v1677_v39 = vor.u32 %v2139_v27, %v1676_v26  ;;  %v1788_v41 = vld [vmem:[#allocation5 + $0x260] sm:$0xf]  ;;  %v1861_v43 = vor.u32 %v2185_v32, %v1860_v30 }
  0x31   :  { %991 = vmatpush.bf16.msra.mxu1 %v1565_v5  ;;  %v1988_v37 = vld [vmem:[#allocation5 + $0x3f0] sm:$0xf]  ;;  %v2217_v38 = vld [vmem:[#allocation5 + $0x3f4] sm:$0xf0]  ;;  %v2167_v42 = vld [vmem:[#allocation5 + $0x264] sm:$0xf0]  ;;  %v1925_v44 = vor.u32 %v2201_v34, %v1924_v33 }
  0x32   :  { %1005 = vmatpush.bf16.msra.mxu2 %v1629_v6  ;;  %v1852_v45 = vld [vmem:[#allocation5 + $0x2e0] sm:$0xf]  ;;  %v2183_v46 = vld [vmem:[#allocation5 + $0x2e4] sm:$0xf0]  ;;  %v1989_v48 = vor.u32 %v2217_v38, %v1988_v37  ;;  %v1780_v52 = vld [vmem:[#allocation5 + $0x250] sm:$0xf]  ;;  %v1789_v56 = vor.u32 %v2167_v42, %v1788_v41 }
  0x33   :  { %1019 = vmatpush.bf16.msra.mxu3 %v1693_v10  ;;  %v1916_v47 = vld [vmem:[#allocation5 + $0x360] sm:$0xf]  ;;  %v2199_v49 = vld [vmem:[#allocation5 + $0x364] sm:$0xf0]  ;;  %v105_v54 = vld [vmem:[#allocation2 + $0x10] sm:$0xff]  ;;  %v1853_v59 = vor.u32 %v2183_v46, %v1852_v45 }
  0x34   :  { %978 = vmatpush.bf16.msra.mxu0 %v1493_v16  ;;  %v1980_v50 = vld [vmem:[#allocation5 + $0x3e0] sm:$0xf]  ;;  %v2215_v51 = vld [vmem:[#allocation5 + $0x3e4] sm:$0xf0]  ;;  %v2165_v57 = vld [vmem:[#allocation5 + $0x254] sm:$0xf0]  ;;  %v1917_v60 = vor.u32 %v2199_v49, %v1916_v47 }
  0x35   :  { %992 = vmatpush.bf16.msra.mxu1 %v1557_v19  ;;  %v103_v53 = vld [vmem:[#allocation2] sm:$0xff]  ;;  %v109_v58 = vld [vmem:[#allocation2 + $0x30] sm:$0xff]  ;;  %v2181_v62 = vld [vmem:[#allocation5 + $0x2d4] sm:$0xf0]  ;;  %137 = vst [vmem:[#allocation1 + $0x1] ss:$4 sm:$0xff] %v105_v54  ;;  %v1981_v63 = vor.u32 %v2215_v51, %v1980_v50  ;;  %v1781_v4 = vor.u32 %v2165_v57, %v1780_v52 }
  0x36   :  { %1006 = vmatpush.bf16.msra.mxu2 %v1621_v20  ;;  %v107_v55 = vld [vmem:[#allocation2 + $0x20] sm:$0xff]  ;;  %135 = vst [vmem:[#allocation1] ss:$4 sm:$0xff] %v103_v53  ;;  %v1844_v61 = vld [vmem:[#allocation5 + $0x2d0] sm:$0xf] }
  0x37   :  { %1020 = vmatpush.bf16.msra.mxu3 %v1685_v24  ;;  %v1908_v0 = vld [vmem:[#allocation5 + $0x350] sm:$0xf]  ;;  %v2197_v1 = vld [vmem:[#allocation5 + $0x354] sm:$0xf0]  ;;  %139 = vst [vmem:[#allocation1 + $0x2] ss:$4 sm:$0xff] %v107_v55  ;;  %v1845_v7 = vor.u32 %v2181_v62, %v1844_v61 }
  0x38   :  { %979 = vmatpush.bf16.msra.mxu0 %v1485_v31  ;;  %v1972_v2 = vld [vmem:[#allocation5 + $0x3d0] sm:$0xf]  ;;  %v2213_v3 = vld [vmem:[#allocation5 + $0x3d4] sm:$0xf0]  ;;  %141 = vst [vmem:[#allocation1 + $0x3] ss:$4 sm:$0xff] %v109_v58  ;;  %v1909_v8 = vor.u32 %v2197_v1, %v1908_v0 }
  0x39   :  { %993 = vmatpush.bf16.msra.mxu1 %v1549_v35  ;;  %v1772_v5 = vld [vmem:[#allocation5 + $0x240] sm:$0xf]  ;;  %v2163_v6 = vld [vmem:[#allocation5 + $0x244] sm:$0xf0]  ;;  %v1973_v12 = vor.u32 %v2213_v3, %v1972_v2  ;;  %v1764_v17 = vld [vmem:[#allocation5 + $0x230] sm:$0xf] }
  0x3a   :  { %1007 = vmatpush.bf16.msra.mxu2 %v1613_v36  ;;  %v1836_v9 = vld [vmem:[#allocation5 + $0x2c0] sm:$0xf]  ;;  %v2179_v10 = vld [vmem:[#allocation5 + $0x2c4] sm:$0xf0]  ;;  %v2161_v18 = vld [vmem:[#allocation5 + $0x234] sm:$0xf0]  ;;  %v1773_v19 = vor.u32 %v2163_v6, %v1772_v5 }
  0x3b   :  { %1021 = vmatpush.bf16.msra.mxu3 %v1677_v39  ;;  %v1900_v11 = vld [vmem:[#allocation5 + $0x340] sm:$0xf]  ;;  %v2195_v13 = vld [vmem:[#allocation5 + $0x344] sm:$0xf0]  ;;  %v113_v20 = vld [vmem:[#allocation2 + $0x50] sm:$0xff]  ;;  %v1837_v24 = vor.u32 %v2179_v10, %v1836_v9  ;;  %v1765_v36 = vor.u32 %v2161_v18, %v1764_v17 }
  0x3c   :  { %1028 = vmatpush.bf16.msrb.mxu0 %v1797_v40  ;;  %v1964_v14 = vld [vmem:[#allocation5 + $0x3c0] sm:$0xf]  ;;  %v2211_v15 = vld [vmem:[#allocation5 + $0x3c4] sm:$0xf0]  ;;  %v1828_v21 = vld [vmem:[#allocation5 + $0x2b0] sm:$0xf]  ;;  %v1901_v25 = vor.u32 %v2195_v13, %v1900_v11 }
  0x3d   :  { %1042 = vmatpush.bf16.msrb.mxu1 %v1861_v43  ;;  %v111_v16 = vld [vmem:[#allocation2 + $0x40] sm:$0xff]  ;;  %v2177_v22 = vld [vmem:[#allocation5 + $0x2b4] sm:$0xf0]  ;;  %v1892_v23 = vld [vmem:[#allocation5 + $0x330] sm:$0xf]  ;;  %v1965_v30 = vor.u32 %v2211_v15, %v1964_v14 }
  0x3e   :  { %1056 = vmatpush.bf16.msrb.mxu2 %v1925_v44  ;;  %v115_v26 = vld [vmem:[#allocation2 + $0x60] sm:$0xff]  ;;  %v2193_v27 = vld [vmem:[#allocation5 + $0x334] sm:$0xf0]  ;;  %v1956_v28 = vld [vmem:[#allocation5 + $0x3b0] sm:$0xf]  ;;  %v1829_v39 = vor.u32 %v2177_v22, %v1828_v21 }
  0x3f   :  { %1070 = vmatpush.bf16.msrb.mxu3 %v1989_v48  ;;  %v2209_v29 = vld [vmem:[#allocation5 + $0x3b4] sm:$0xf0]  ;;  %v117_v31 = vld [vmem:[#allocation2 + $0x70] sm:$0xff]  ;;  %v2479_v33 = vld.sshfl [vmem:[#allocation1 + $0x8] sm:$0xff pattern:$0x73625140]  ;;  %v1893_v40 = vor.u32 %v2193_v27, %v1892_v23 }
  0x40   :  { %1029 = vmatpush.bf16.msrb.mxu0 %v1789_v56  ;;  %v150_v32 = vld.sshfl [vmem:[#allocation1] sm:$0xff pattern:$0x73625140]  ;;  %v152_v34 = vld.sshfl [vmem:[#allocation1 + $0x10] sm:$0xff pattern:$0x73625140]  ;;  %v1957_v43 = vor.u32 %v2209_v29, %v1956_v28 }
  0x41   :  { %1043 = vmatpush.bf16.msrb.mxu1 %v1853_v59  ;;  %v2481_v35 = vld.sshfl [vmem:[#allocation1 + $0x18] sm:$0xff pattern:$0x73625140]  ;;  %v1756_v37 = vld [vmem:[#allocation5 + $0x220] sm:$0xf]  ;;  %v104_v61 = vld [vmem:[#allocation2 + $0x8] sm:$0xff] }
  0x42   :  { %1057 = vmatpush.bf16.msrb.mxu2 %v1917_v60  ;;  %158 = vst [vmem:[#allocation1] ss:$4 sm:$0xff] %v111_v16  ;;  %v2159_v38 = vld [vmem:[#allocation5 + $0x224] sm:$0xf0]  ;;  %v1820_v41 = vld [vmem:[#allocation5 + $0x2a0] sm:$0xf] }
  0x43   :  { %1071 = vmatpush.bf16.msrb.mxu3 %v1981_v63  ;;  %159 = vst [vmem:[#allocation1 + $0x1] ss:$4 sm:$0xff] %v113_v20  ;;  %v2175_v42 = vld [vmem:[#allocation5 + $0x2a4] sm:$0xf0]  ;;  %v1884_v44 = vld [vmem:[#allocation5 + $0x320] sm:$0xf]  ;;  %v1757_v48 = vor.u32 %v2159_v38, %v1756_v37 }
  0x44   :  { %1030 = vmatpush.bf16.msrb.mxu0 %v1781_v4  ;;  %160 = vst [vmem:[#allocation1 + $0x2] ss:$4 sm:$0xff] %v115_v26  ;;  %v2191_v45 = vld [vmem:[#allocation5 + $0x324] sm:$0xf0]  ;;  %v1948_v46 = vld [vmem:[#allocation5 + $0x3a0] sm:$0xf]  ;;  %v1821_v50 = vor.u32 %v2175_v42, %v1820_v41 }
  0x45   :  { %1044 = vmatpush.bf16.msrb.mxu1 %v1845_v7  ;;  %161 = vst [vmem:[#allocation1 + $0x3] ss:$4 sm:$0xff] %v117_v31  ;;  %v2207_v47 = vld [vmem:[#allocation5 + $0x3a4] sm:$0xf0]  ;;  %v1748_v49 = vld [vmem:[#allocation5 + $0x210] sm:$0xf]  ;;  %v1885_v51 = vor.u32 %v2191_v45, %v1884_v44 }
  0x46   :  { %1058 = vmatpush.bf16.msrb.mxu2 %v1909_v8  ;;  %v2157_v52 = vld [vmem:[#allocation5 + $0x214] sm:$0xf0]  ;;  %v1812_v53 = vld [vmem:[#allocation5 + $0x290] sm:$0xf]  ;;  %v1949_v55 = vor.u32 %v2207_v47, %v1948_v46  ;;  %v1740_v60 = vld [vmem:[#allocation5 + $0x200] sm:$0xf] }
  0x47   :  { %1072 = vmatpush.bf16.msrb.mxu3 %v1973_v12  ;;  %v2173_v54 = vld [vmem:[#allocation5 + $0x294] sm:$0xf0]  ;;  %v1876_v56 = vld [vmem:[#allocation5 + $0x310] sm:$0xf]  ;;  %v1749_v63 = vor.u32 %v2157_v52, %v1748_v49  ;;  %v2155_v0 = vld [vmem:[#allocation5 + $0x204] sm:$0xf0] }
  0x48   :  { %1031 = vmatpush.bf16.msrb.mxu0 %v1773_v19  ;;  %v2189_v57 = vld [vmem:[#allocation5 + $0x314] sm:$0xf0]  ;;  %v1940_v58 = vld [vmem:[#allocation5 + $0x390] sm:$0xf]  ;;  %v2104_v1 = vld [vmem:[#allocation5 + $0x74] sm:$0xf]  ;;  %v1813_v7 = vor.u32 %v2173_v54, %v1812_v53  ;;  %v1741_v21 = vor.u32 %v2155_v0, %v1740_v60 }
  0x49   :  { %1045 = vmatpush.bf16.msrb.mxu1 %v1837_v24  ;;  %v2205_v59 = vld [vmem:[#allocation5 + $0x394] sm:$0xf0]  ;;  %143 = vst [vmem:[#allocation1 + $0x20] ss:$4 sm:$0xff] %v104_v61  ;;  %v1542_v2 = vld [vmem:[#allocation5 + $0x78] sm:$0xf0]  ;;  %v1877_v16 = vor.u32 %v2189_v57, %v1876_v56 }
  0x4a   :  { %1059 = vmatpush.bf16.msrb.mxu2 %v1901_v25  ;;  %v106_v62 = vld [vmem:[#allocation2 + $0x18] sm:$0xff]  ;;  %v108_v3 = vld [vmem:[#allocation2 + $0x28] sm:$0xff]  ;;  %v1804_v8 = vld [vmem:[#allocation5 + $0x280] sm:$0xf]  ;;  %v1941_v17 = vor.u32 %v2205_v59, %v1940_v58  ;;  %v1545_v24 = vor.u32 %v2104_v1, %v1542_v2 }
  0x4b   :  { %1073 = vmatpush.bf16.msrb.mxu3 %v1965_v30  ;;  %v110_v4 = vld [vmem:[#allocation2 + $0x38] sm:$0xff]  ;;  %145 = vst [vmem:[#allocation1 + $0x21] ss:$4 sm:$0xff] %v106_v62  ;;  %v2171_v9 = vld [vmem:[#allocation5 + $0x284] sm:$0xf0] }
  0x4c   :  { %1032 = vmatpush.bf16.msrb.mxu0 %v1765_v36  ;;  %v166_v5 = vld.sshfl [vmem:[#allocation1] sm:$0xff pattern:$0x73625140]  ;;  %v168_v6 = vld.sshfl [vmem:[#allocation1 + $0x10] sm:$0xff pattern:$0x73625140]  ;;  %v1805_v30 = vor.u32 %v2171_v9, %v1804_v8 }
  0x4d   :  { %1046 = vmatpush.bf16.msrb.mxu1 %v1829_v39  ;;  %v1868_v10 = vld [vmem:[#allocation5 + $0x300] sm:$0xf]  ;;  %v2187_v11 = vld [vmem:[#allocation5 + $0x304] sm:$0xf0]  ;;  %v2483_v12 = vpack.c.bf16 %v166_v5, %v150_v32  ;;  %v2485_v13 = vpack.c.bf16 %v168_v6, %v152_v34  ;;  %v2120_v23 = vld [vmem:[#allocation5 + $0xf4] sm:$0xf] }
  0x4e   :  { %1060 = vmatpush.bf16.msrb.mxu2 %v1893_v40  ;;  %v167_v14 = vld.sshfl [vmem:[#allocation1 + $0x8] sm:$0xff pattern:$0x73625140]  ;;  %v169_v15 = vld.sshfl [vmem:[#allocation1 + $0x18] sm:$0xff pattern:$0x73625140]  ;;  %v1869_v31 = vor.u32 %v2187_v11, %v1868_v10 }
  0x4f   :  { %1074 = vmatpush.bf16.msrb.mxu3 %v1957_v43  ;;  %v1932_v18 = vld [vmem:[#allocation5 + $0x380] sm:$0xf]  ;;  %v2488_v19 = vpack.c.bf16 %v167_v14, %v2479_v33  ;;  %v2491_v20 = vpack.c.bf16 %v169_v15, %v2481_v35  ;;  %v2203_v22 = vld [vmem:[#allocation5 + $0x384] sm:$0xf0]  ;;  %147 = vst [vmem:[#allocation1 + $0x22] ss:$4 sm:$0xff] %v108_v3  ;;  %980 = vmatmul.bf16.vlgmr.msra.gmra.mxu0 %v2483_v12 }
  0x50   :  { %1033 = vmatpush.bf16.msrb.mxu0 %v1757_v48  ;;  %1008 = vmatmul.bf16.vlgmr.msra.gmra.mxu2 %v2485_v13  ;;  %v1606_v25 = vld [vmem:[#allocation5 + $0xf8] sm:$0xf0]  ;;  %v2136_v26 = vld [vmem:[#allocation5 + $0x174] sm:$0xf]  ;;  %149 = vst [vmem:[#allocation1 + $0x23] ss:$4 sm:$0xff] %v110_v4  ;;  %v1933_v34 = vor.u32 %v2203_v22, %v1932_v18 }
  0x51   :  { %1047 = vmatpush.bf16.msrb.mxu1 %v1821_v50  ;;  %1022 = vmatmul.bf16.vlgmr.msra.gmra.mxu3 %v2491_v20  ;;  %v1670_v27 = vld [vmem:[#allocation5 + $0x178] sm:$0xf0]  ;;  %v2152_v28 = vld [vmem:[#allocation5 + $0x1f4] sm:$0xf]  ;;  %v2102_v32 = vld [vmem:[#allocation5 + $0x64] sm:$0xf]  ;;  %v1609_v35 = vor.u32 %v2120_v23, %v1606_v25 }
  0x52   :  { %1061 = vmatpush.bf16.msrb.mxu2 %v1885_v51  ;;  %994 = vmatmul.bf16.vlgmr.msra.gmra.mxu1 %v2488_v19  ;;  %v1734_v29 = vld [vmem:[#allocation5 + $0x1f8] sm:$0xf0]  ;;  %v1534_v33 = vld [vmem:[#allocation5 + $0x68] sm:$0xf0]  ;;  %v2118_v36 = vld [vmem:[#allocation5 + $0xe4] sm:$0xf]  ;;  %v1673_v37 = vor.u32 %v2136_v26, %v1670_v27 }
  0x53   :  { %1075 = vmatpush.bf16.msrb.mxu3 %v1949_v55  ;;  %v1737_v38 = vor.u32 %v2152_v28, %v1734_v29  ;;  %v112_v39 = vld [vmem:[#allocation2 + $0x48] sm:$0xff]  ;;  %v2134_v41 = vld [vmem:[#allocation5 + $0x164] sm:$0xf]  ;;  %v114_v43 = vld [vmem:[#allocation2 + $0x58] sm:$0xff]  ;;  %v1537_v44 = vor.u32 %v2102_v32, %v1534_v33 }
  0x54   :  { %1034 = vmatpush.bf16.msrb.mxu0 %v1749_v63  ;;  %v1598_v40 = vld [vmem:[#allocation5 + $0xe8] sm:$0xf0]  ;;  %v2150_v45 = vld [vmem:[#allocation5 + $0x1e4] sm:$0xf]  ;;  %v2100_v47 = vld [vmem:[#allocation5 + $0x54] sm:$0xf] }
  0x55   :  { %1048 = vmatpush.bf16.msrb.mxu1 %v1813_v7  ;;  %v1662_v42 = vld [vmem:[#allocation5 + $0x168] sm:$0xf0]  ;;  %v1526_v49 = vld [vmem:[#allocation5 + $0x58] sm:$0xf0]  ;;  %v2116_v50 = vld [vmem:[#allocation5 + $0xd4] sm:$0xf]  ;;  %v1601_v55 = vor.u32 %v2118_v36, %v1598_v40 }
  0x56   :  { %1062 = vmatpush.bf16.msrb.mxu2 %v1877_v16  ;;  %v1726_v46 = vld [vmem:[#allocation5 + $0x1e8] sm:$0xf0]  ;;  %v1590_v51 = vld [vmem:[#allocation5 + $0xd8] sm:$0xf0]  ;;  %v2132_v56 = vld [vmem:[#allocation5 + $0x154] sm:$0xf]  ;;  %v1665_v60 = vor.u32 %v2134_v41, %v1662_v42  ;;  %v1529_v62 = vor.u32 %v2100_v47, %v1526_v49 }
  0x57   :  { %1076 = vmatpush.bf16.msrb.mxu3 %v1941_v17  ;;  %v116_v48 = vld [vmem:[#allocation2 + $0x68] sm:$0xff]  ;;  %v118_v52 = vld [vmem:[#allocation2 + $0x78] sm:$0xff]  ;;  %v2497_v54 = vld.sshfl [vmem:[#allocation1 + $0x28] sm:$0xff pattern:$0x73625140]  ;;  %v1729_v61 = vor.u32 %v2150_v45, %v1726_v46  ;;  %v1593_v3 = vor.u32 %v2116_v50, %v1590_v51 }
  0x58   :  { %1035 = vmatpush.bf16.msrb.mxu0 %v1741_v21  ;;  %v154_v53 = vld.sshfl [vmem:[#allocation1 + $0x20] sm:$0xff pattern:$0x73625140]  ;;  %v156_v58 = vld.sshfl [vmem:[#allocation1 + $0x30] sm:$0xff pattern:$0x73625140] }
  0x59   :  { %1049 = vmatpush.bf16.msrb.mxu1 %v1805_v30  ;;  %v1654_v57 = vld [vmem:[#allocation5 + $0x158] sm:$0xf0]  ;;  %v157_v59 = vld.sshfl [vmem:[#allocation1 + $0x38] sm:$0xff pattern:$0x73625140] }
  0x5a   :  { %1063 = vmatpush.bf16.msrb.mxu2 %v1869_v31  ;;  %162 = vst [vmem:[#allocation1 + $0x20] ss:$4 sm:$0xff] %v112_v39  ;;  %v2148_v63 = vld [vmem:[#allocation5 + $0x1d4] sm:$0xf]  ;;  %v1718_v0 = vld [vmem:[#allocation5 + $0x1d8] sm:$0xf0]  ;;  %v1657_v5 = vor.u32 %v2132_v56, %v1654_v57 }
  0x5b   :  { %1077 = vmatpush.bf16.msrb.mxu3 %v1933_v34  ;;  %163 = vst [vmem:[#allocation1 + $0x21] ss:$4 sm:$0xff] %v114_v43  ;;  %v2098_v1 = vld [vmem:[#allocation5 + $0x44] sm:$0xf]  ;;  %v1518_v2 = vld [vmem:[#allocation5 + $0x48] sm:$0xf0]  ;;  %v1721_v6 = vor.u32 %v2148_v63, %v1718_v0 }
  0x5c   :  { %1084 = vmatpush.bf16.msra.mxu0 %v1545_v24  ;;  %164 = vst [vmem:[#allocation1 + $0x22] ss:$4 sm:$0xff] %v116_v48  ;;  %v2114_v4 = vld [vmem:[#allocation5 + $0xc4] sm:$0xf]  ;;  %v1582_v7 = vld [vmem:[#allocation5 + $0xc8] sm:$0xf0]  ;;  %v1521_v9 = vor.u32 %v2098_v1, %v1518_v2 }
  0x5d   :  { %1098 = vmatpush.bf16.msra.mxu1 %v1609_v35  ;;  %165 = vst [vmem:[#allocation1 + $0x23] ss:$4 sm:$0xff] %v118_v52  ;;  %v2130_v8 = vld [vmem:[#allocation5 + $0x144] sm:$0xf]  ;;  %v1646_v10 = vld [vmem:[#allocation5 + $0x148] sm:$0xf0]  ;;  %v1585_v17 = vor.u32 %v2114_v4, %v1582_v7 }
  0x5e   :  { %1112 = vmatpush.bf16.msra.mxu2 %v1673_v37  ;;  %v2146_v11 = vld [vmem:[#allocation5 + $0x1c4] sm:$0xf]  ;;  %v1710_v14 = vld [vmem:[#allocation5 + $0x1c8] sm:$0xf0]  ;;  %v2096_v15 = vld [vmem:[#allocation5 + $0x34] sm:$0xf]  ;;  %v1649_v18 = vor.u32 %v2130_v8, %v1646_v10 }
  0x5f   :  { %1126 = vmatpush.bf16.msra.mxu3 %v1737_v38  ;;  %v1510_v16 = vld [vmem:[#allocation5 + $0x38] sm:$0xf0]  ;;  %v1713_v21 = vor.u32 %v2146_v11, %v1710_v14  ;;  %v2112_v22 = vld [vmem:[#allocation5 + $0xb4] sm:$0xf]  ;;  %v2094_v29 = vld [vmem:[#allocation5 + $0x24] sm:$0xf] }
  0x60   :  { %1085 = vmatpush.bf16.msra.mxu0 %v1537_v44  ;;  %v1574_v23 = vld [vmem:[#allocation5 + $0xb8] sm:$0xf0]  ;;  %v1513_v24 = vor.u32 %v2096_v15, %v1510_v16  ;;  %v2128_v25 = vld [vmem:[#allocation5 + $0x134] sm:$0xf]  ;;  %v1502_v30 = vld [vmem:[#allocation5 + $0x28] sm:$0xf0] }
  0x61   :  { %1099 = vmatpush.bf16.msra.mxu1 %v1601_v55  ;;  %v1638_v26 = vld [vmem:[#allocation5 + $0x138] sm:$0xf0]  ;;  %v2144_v27 = vld [vmem:[#allocation5 + $0x1b4] sm:$0xf]  ;;  %v1577_v33 = vor.u32 %v2112_v22, %v1574_v23  ;;  %v2110_v34 = vld [vmem:[#allocation5 + $0xa4] sm:$0xf]  ;;  %v1505_v44 = vor.u32 %v2094_v29, %v1502_v30 }
  0x62   :  { %1113 = vmatpush.bf16.msra.mxu2 %v1665_v60  ;;  %v1702_v28 = vld [vmem:[#allocation5 + $0x1b8] sm:$0xf0]  ;;  %v1566_v35 = vld [vmem:[#allocation5 + $0xa8] sm:$0xf0]  ;;  %v1641_v40 = vor.u32 %v2128_v25, %v1638_v26  ;;  %v2126_v45 = vld [vmem:[#allocation5 + $0x124] sm:$0xf] }
  0x63   :  { %1127 = vmatpush.bf16.msra.mxu3 %v1729_v61  ;;  %v1705_v43 = vor.u32 %v2144_v27, %v1702_v28  ;;  %v1630_v46 = vld [vmem:[#allocation5 + $0x128] sm:$0xf0]  ;;  %v2142_v47 = vld [vmem:[#allocation5 + $0x1a4] sm:$0xf]  ;;  %v2092_v49 = vld [vmem:[#allocation5 + $0x14] sm:$0xf]  ;;  %v1569_v51 = vor.u32 %v2110_v34, %v1566_v35 }
  0x64   :  { %1086 = vmatpush.bf16.msra.mxu0 %v1529_v62  ;;  %v170_v31 = vld.sshfl [vmem:[#allocation1 + $0x20] sm:$0xff pattern:$0x73625140]  ;;  %v172_v32 = vld.sshfl [vmem:[#allocation1 + $0x30] sm:$0xff pattern:$0x73625140]  ;;  %v1633_v52 = vor.u32 %v2126_v45, %v1630_v46 }
  0x65   :  { %1100 = vmatpush.bf16.msra.mxu1 %v1593_v3  ;;  %v2499_v36 = vpack.c.bf16 %v170_v31, %v154_v53  ;;  %v2501_v37 = vpack.c.bf16 %v172_v32, %v156_v58  ;;  %v171_v38 = vld.sshfl [vmem:[#allocation1 + $0x28] sm:$0xff pattern:$0x73625140]  ;;  %v173_v39 = vld.sshfl [vmem:[#allocation1 + $0x38] sm:$0xff pattern:$0x73625140] }
  0x66   :  { %1114 = vmatpush.bf16.msra.mxu2 %v1657_v5  ;;  %v2504_v41 = vpack.c.bf16 %v171_v38, %v2497_v54  ;;  %v2506_v42 = vpack.c.bf16 %v173_v39, %v157_v59  ;;  %v1694_v48 = vld [vmem:[#allocation5 + $0x1a8] sm:$0xf0]  ;;  %v1494_v50 = vld [vmem:[#allocation5 + $0x18] sm:$0xf0]  ;;  %v2108_v53 = vld [vmem:[#allocation5 + $0x94] sm:$0xf] }
  0x67   :  { %1128 = vmatpush.bf16.msra.mxu3 %v1721_v6  ;;  %1036 = vmatmul.bf16.vlgmr.msrb.gmra.mxu0 %v2499_v36  ;;  %v1558_v54 = vld [vmem:[#allocation5 + $0x98] sm:$0xf0]  ;;  %v1697_v55 = vor.u32 %v2142_v47, %v1694_v48  ;;  %v1497_v56 = vor.u32 %v2092_v49, %v1494_v50  ;;  %v2124_v57 = vld [vmem:[#allocation5 + $0x114] sm:$0xf]  ;;  %v2090_v61 = vld [vmem:[#allocation5 + $0x4] sm:$0xf] }
  0x68   :  { %1087 = vmatpush.bf16.msra.mxu0 %v1521_v9  ;;  %1064 = vmatmul.bf16.vlgmr.msrb.gmra.mxu2 %v2501_v37  ;;  %v1622_v58 = vld [vmem:[#allocation5 + $0x118] sm:$0xf0]  ;;  %v2140_v59 = vld [vmem:[#allocation5 + $0x194] sm:$0xf]  ;;  %v1486_v62 = vld [vmem:[#allocation5 + $0x8] sm:$0xf0]  ;;  %v1561_v1 = vor.u32 %v2108_v53, %v1558_v54 }
  0x69   :  { %1101 = vmatpush.bf16.msra.mxu1 %v1585_v17  ;;  %1078 = vmatmul.bf16.vlgmr.msrb.gmra.mxu3 %v2506_v42  ;;  %v1686_v60 = vld [vmem:[#allocation5 + $0x198] sm:$0xf0]  ;;  %v2168_v63 = vld [vmem:[#allocation5 + $0x274] sm:$0xf]  ;;  %v1625_v2 = vor.u32 %v2124_v57, %v1622_v58  ;;  %v2106_v3 = vld [vmem:[#allocation5 + $0x84] sm:$0xf]  ;;  %v1489_v7 = vor.u32 %v2090_v61, %v1486_v62 }
  0x6a   :  { %1115 = vmatpush.bf16.msra.mxu2 %v1649_v18  ;;  %1050 = vmatmul.bf16.vlgmr.msrb.gmra.mxu1 %v2504_v41  ;;  %v1798_v0 = vld [vmem:[#allocation5 + $0x278] sm:$0xf0]  ;;  %v1550_v4 = vld [vmem:[#allocation5 + $0x88] sm:$0xf0]  ;;  %v2122_v5 = vld [vmem:[#allocation5 + $0x104] sm:$0xf]  ;;  %v1689_v6 = vor.u32 %v2140_v59, %v1686_v60 }
  0x6b   :  { %1129 = vmatpush.bf16.msra.mxu3 %v1713_v21  ;;  %v1614_v8 = vld [vmem:[#allocation5 + $0x108] sm:$0xf0]  ;;  %v2138_v9 = vld [vmem:[#allocation5 + $0x184] sm:$0xf]  ;;  %v1801_v11 = vor.u32 %v2168_v63, %v1798_v0  ;;  %v2184_v14 = vld [vmem:[#allocation5 + $0x2f4] sm:$0xf]  ;;  %v1553_v22 = vor.u32 %v2106_v3, %v1550_v4 }
  0x6c   :  { %1088 = vmatpush.bf16.msra.mxu0 %v1513_v24  ;;  %v1678_v10 = vld [vmem:[#allocation5 + $0x188] sm:$0xf0]  ;;  %v1862_v15 = vld [vmem:[#allocation5 + $0x2f8] sm:$0xf0]  ;;  %v2200_v16 = vld [vmem:[#allocation5 + $0x374] sm:$0xf]  ;;  %v1617_v23 = vor.u32 %v2122_v5, %v1614_v8 }
  0x6d   :  { %1102 = vmatpush.bf16.msra.mxu1 %v1577_v33  ;;  %v1926_v17 = vld [vmem:[#allocation5 + $0x378] sm:$0xf0]  ;;  %v2216_v18 = vld [vmem:[#allocation5 + $0x3f4] sm:$0xf]  ;;  %v2166_v24 = vld [vmem:[#allocation5 + $0x264] sm:$0xf]  ;;  %v1681_v26 = vor.u32 %v2138_v9, %v1678_v10  ;;  %v1865_v27 = vor.u32 %v2184_v14, %v1862_v15 }
  0x6e   :  { %1116 = vmatpush.bf16.msra.mxu2 %v1641_v40  ;;  %v1990_v21 = vld [vmem:[#allocation5 + $0x3f8] sm:$0xf0]  ;;  %v1790_v25 = vld [vmem:[#allocation5 + $0x268] sm:$0xf0]  ;;  %v1929_v28 = vor.u32 %v2200_v16, %v1926_v17  ;;  %v2182_v30 = vld [vmem:[#allocation5 + $0x2e4] sm:$0xf] }
  0x6f   :  { %1130 = vmatpush.bf16.msra.mxu3 %v1705_v43  ;;  %v1993_v29 = vor.u32 %v2216_v18, %v1990_v21  ;;  %v1854_v31 = vld [vmem:[#allocation5 + $0x2e8] sm:$0xf0]  ;;  %v2198_v32 = vld [vmem:[#allocation5 + $0x364] sm:$0xf]  ;;  %v1793_v33 = vor.u32 %v2166_v24, %v1790_v25  ;;  %v2164_v39 = vld [vmem:[#allocation5 + $0x254] sm:$0xf] }
  0x70   :  { %1089 = vmatpush.bf16.msra.mxu0 %v1505_v44  ;;  %v1918_v34 = vld [vmem:[#allocation5 + $0x368] sm:$0xf0]  ;;  %v2214_v35 = vld [vmem:[#allocation5 + $0x3e4] sm:$0xf]  ;;  %v1782_v40 = vld [vmem:[#allocation5 + $0x258] sm:$0xf0]  ;;  %v1857_v43 = vor.u32 %v2182_v30, %v1854_v31 }
  0x71   :  { %1103 = vmatpush.bf16.msra.mxu1 %v1569_v51  ;;  %v1982_v38 = vld [vmem:[#allocation5 + $0x3e8] sm:$0xf0]  ;;  %v1921_v44 = vor.u32 %v2198_v32, %v1918_v34  ;;  %v2180_v46 = vld [vmem:[#allocation5 + $0x2d4] sm:$0xf]  ;;  %v1846_v47 = vld [vmem:[#allocation5 + $0x2d8] sm:$0xf0]  ;;  %v1785_v49 = vor.u32 %v2164_v39, %v1782_v40 }
  0x72   :  { %1117 = vmatpush.bf16.msra.mxu2 %v1633_v52  ;;  %v1985_v45 = vor.u32 %v2214_v35, %v1982_v38  ;;  %v2196_v48 = vld [vmem:[#allocation5 + $0x354] sm:$0xf]  ;;  %v1910_v50 = vld [vmem:[#allocation5 + $0x358] sm:$0xf0]  ;;  %v2162_v53 = vld [vmem:[#allocation5 + $0x244] sm:$0xf] }
  0x73   :  { %1131 = vmatpush.bf16.msra.mxu3 %v1697_v55  ;;  %v2212_v51 = vld [vmem:[#allocation5 + $0x3d4] sm:$0xf]  ;;  %v1974_v52 = vld [vmem:[#allocation5 + $0x3d8] sm:$0xf0]  ;;  %v1774_v54 = vld [vmem:[#allocation5 + $0x248] sm:$0xf0]  ;;  %v1849_v55 = vor.u32 %v2180_v46, %v1846_v47 }
  0x74   :  { %1090 = vmatpush.bf16.msra.mxu0 %v1497_v56  ;;  %v1913_v56 = vor.u32 %v2196_v48, %v1910_v50  ;;  %v1977_v57 = vor.u32 %v2212_v51, %v1974_v52  ;;  %v2178_v58 = vld [vmem:[#allocation5 + $0x2c4] sm:$0xf]  ;;  %v1838_v59 = vld [vmem:[#allocation5 + $0x2c8] sm:$0xf0]  ;;  %v2160_v63 = vld [vmem:[#allocation5 + $0x234] sm:$0xf] }
  0x75   :  { %1104 = vmatpush.bf16.msra.mxu1 %v1561_v1  ;;  %v2194_v60 = vld [vmem:[#allocation5 + $0x344] sm:$0xf]  ;;  %v1902_v61 = vld [vmem:[#allocation5 + $0x348] sm:$0xf0]  ;;  %v1841_v0 = vor.u32 %v2178_v58, %v1838_v59  ;;  %v2176_v3 = vld [vmem:[#allocation5 + $0x2b4] sm:$0xf] }
  0x76   :  { %1118 = vmatpush.bf16.msra.mxu2 %v1625_v2  ;;  %v2210_v62 = vld [vmem:[#allocation5 + $0x3c4] sm:$0xf]  ;;  %v1905_v1 = vor.u32 %v2194_v60, %v1902_v61  ;;  %v1830_v4 = vld [vmem:[#allocation5 + $0x2b8] sm:$0xf0]  ;;  %v2192_v5 = vld [vmem:[#allocation5 + $0x334] sm:$0xf] }
  0x77   :  { %1132 = vmatpush.bf16.msra.mxu3 %v1689_v6  ;;  %v2208_v8 = vld [vmem:[#allocation5 + $0x3b4] sm:$0xf]  ;;  %v2158_v9 = vld [vmem:[#allocation5 + $0x224] sm:$0xf]  ;;  %v1758_v10 = vld [vmem:[#allocation5 + $0x228] sm:$0xf0] }
  0x78   :  { %1091 = vmatpush.bf16.msra.mxu0 %v1489_v7  ;;  %v1894_v7 = vld [vmem:[#allocation5 + $0x338] sm:$0xf0]  ;;  %v2174_v16 = vld [vmem:[#allocation5 + $0x2a4] sm:$0xf]  ;;  %v1822_v17 = vld [vmem:[#allocation5 + $0x2a8] sm:$0xf0]  ;;  %v1761_v21 = vor.u32 %v2158_v9, %v1758_v10 }
  0x79   :  { %1105 = vmatpush.bf16.msra.mxu1 %v1553_v22  ;;  %v1897_v14 = vor.u32 %v2192_v5, %v1894_v7  ;;  %v2190_v18 = vld [vmem:[#allocation5 + $0x324] sm:$0xf]  ;;  %v1886_v22 = vld [vmem:[#allocation5 + $0x328] sm:$0xf0]  ;;  %v2156_v25 = vld [vmem:[#allocation5 + $0x214] sm:$0xf] }
  0x7a   :  { %1119 = vmatpush.bf16.msra.mxu2 %v1617_v23  ;;  %v2206_v23 = vld [vmem:[#allocation5 + $0x3a4] sm:$0xf]  ;;  %v1950_v24 = vld [vmem:[#allocation5 + $0x3a8] sm:$0xf0]  ;;  %v2172_v30 = vld [vmem:[#allocation5 + $0x294] sm:$0xf] }
  0x7b   :  { %1133 = vmatpush.bf16.msra.mxu3 %v1681_v26  ;;  %1092 = vmatmul.bf16.vlgmr.msra.gmra.mxu0 %v2483_v12  ;;  %v1966_v12 = vld [vmem:[#allocation5 + $0x3c8] sm:$0xf0]  ;;  %v1750_v26 = vld [vmem:[#allocation5 + $0x218] sm:$0xf0]  ;;  %v2188_v32 = vld [vmem:[#allocation5 + $0x314] sm:$0xf] }
  0x7c   :  { %1140 = vmatpush.bf16.msrb.mxu0 %v1801_v11  ;;  %1106 = vmatmul.bf16.vlgmr.msra.gmra.mxu1 %v2488_v19  ;;  %v1969_v2 = vor.u32 %v2210_v62, %v1966_v12  ;;  %v1958_v19 = vld [vmem:[#allocation5 + $0x3b8] sm:$0xf0]  ;;  %v1833_v11 = vor.u32 %v2176_v3, %v1830_v4  ;;  %v2204_v35 = vld [vmem:[#allocation5 + $0x394] sm:$0xf]  ;;  %v2154_v39 = vld [vmem:[#allocation5 + $0x204] sm:$0xf] }
  0x7d   :  { %1154 = vmatpush.bf16.msrb.mxu1 %v1865_v27  ;;  %1120 = vmatmul.bf16.vlgmr.msra.gmra.mxu2 %v2485_v13  ;;  %v1777_v13 = vor.u32 %v2162_v53, %v1774_v54  ;;  %v1961_v15 = vor.u32 %v2208_v8, %v1958_v19  ;;  %v1825_v27 = vor.u32 %v2174_v16, %v1822_v17  ;;  %v1814_v31 = vld [vmem:[#allocation5 + $0x298] sm:$0xf0]  ;;  %v1742_v40 = vld [vmem:[#allocation5 + $0x208] sm:$0xf0]  ;;  %v2170_v46 = vld [vmem:[#allocation5 + $0x284] sm:$0xf] }
  0x7e   :  { %1168 = vmatpush.bf16.msrb.mxu2 %v1929_v28  ;;  %1134 = vmatmul.bf16.vlgmr.msra.gmra.mxu3 %v2491_v20  ;;  %v1766_v20 = vld [vmem:[#allocation5 + $0x238] sm:$0xf0]  ;;  %v1889_v28 = vor.u32 %v2190_v18, %v1886_v22  ;;  %v1806_v47 = vld [vmem:[#allocation5 + $0x288] sm:$0xf0]  ;;  %v2186_v48 = vld [vmem:[#allocation5 + $0x304] sm:$0xf] }
  0x7f   :  { %1182 = vmatpush.bf16.msrb.mxu3 %v1993_v29  ;;  %v1769_v6 = vor.u32 %v2160_v63, %v1766_v20  ;;  %v1953_v29 = vor.u32 %v2206_v23, %v1950_v24  ;;  %v1878_v34 = vld [vmem:[#allocation5 + $0x318] sm:$0xf0]  ;;  %v1870_v50 = vld [vmem:[#allocation5 + $0x308] sm:$0xf0]  ;;  %v2202_v51 = vld [vmem:[#allocation5 + $0x384] sm:$0xf]  ;;  %v1809_v53 = vor.u32 %v2170_v46, %v1806_v47 }
  0x80   :  { %1141 = vmatpush.bf16.msrb.mxu0 %v1793_v33  ;;  %v1753_v33 = vor.u32 %v2156_v25, %v1750_v26  ;;  %v1942_v38 = vld [vmem:[#allocation5 + $0x398] sm:$0xf0]  ;;  %v1934_v52 = vld [vmem:[#allocation5 + $0x388] sm:$0xf0]  ;;  %v1873_v54 = vor.u32 %v2186_v48, %v1870_v50  ;;  %v2222_v59 = vld [vmem:[#allocation8 + $0x20] sm:$0xff] }
  0x81   :  { %1155 = vmatpush.bf16.msrb.mxu1 %v1857_v43  ;;  %v1817_v43 = vor.u32 %v2172_v30, %v1814_v31  ;;  %v2223_v58 = vld [vmem:[#allocation8 + $0x28] sm:$0xff]  ;;  %v2221_v60 = vld [vmem:[#allocation8 + $0x18] sm:$0xff]  ;;  %v2220_v61 = vld [vmem:[#allocation8 + $0x10] sm:$0xff] }
  0x82   :  { %1169 = vmatpush.bf16.msrb.mxu2 %v1921_v44  ;;  %v1881_v44 = vor.u32 %v2188_v32, %v1878_v34  ;;  %v2218_v20 = vld [vmem:[#allocation8] sm:$0xff]  ;;  %v2231_v31 = vld [vmem:[#allocation8 + $0x68] sm:$0xff] }
  0x83   :  { %1183 = vmatpush.bf16.msrb.mxu3 %v1985_v45  ;;  %v1945_v45 = vor.u32 %v2204_v35, %v1942_v38  ;;  %v2230_v34 = vld [vmem:[#allocation8 + $0x60] sm:$0xff] }
  0x84   :  { %1142 = vmatpush.bf16.msrb.mxu0 %v1785_v49  ;;  %v1745_v49 = vor.u32 %v2154_v39, %v1742_v40 }
  0x85   :  { %1156 = vmatpush.bf16.msrb.mxu1 %v1849_v55  ;;  %v1937_v55 = vor.u32 %v2202_v51, %v1934_v52  ;;  %v2227_v52 = vld [vmem:[#allocation8 + $0x48] sm:$0xff] }
  0x86   :  { %1170 = vmatpush.bf16.msrb.mxu2 %v1913_v56  ;;  %v2225_v56 = vld [vmem:[#allocation8 + $0x38] sm:$0xff] }
  0x87   :  { %1184 = vmatpush.bf16.msrb.mxu3 %v1977_v57  ;;  %v2224_v57 = vld [vmem:[#allocation8 + $0x30] sm:$0xff] }
  0x88   :  { %1143 = vmatpush.bf16.msrb.mxu0 %v1777_v13  ;;  %v2520_v13 = vld [vmem:[#allocation7] sm:$0x3] }
  0x89   :  { %1157 = vmatpush.bf16.msrb.mxu1 %v1841_v0  ;;  %v329_v47 = vperm.slane %v2520_v13, 1 }
  0x8a   :  { %1171 = vmatpush.bf16.msrb.mxu2 %v1905_v1 }
  0x8b   :  { %1185 = vmatpush.bf16.msrb.mxu3 %v1969_v2 }
  0x8c   :  { %1144 = vmatpush.bf16.msrb.mxu0 %v1769_v6 }
  0x8d   :  { %1158 = vmatpush.bf16.msrb.mxu1 %v1833_v11 }
  0x8e   :  { %1172 = vmatpush.bf16.msrb.mxu2 %v1897_v14  ;;  %v2233_v14 = vld [vmem:[#allocation8 + $0x78] sm:$0xff] }
  0x8f   :  { %1186 = vmatpush.bf16.msrb.mxu3 %v1961_v15  ;;  %v2232_v15 = vld [vmem:[#allocation8 + $0x70] sm:$0xff] }
  0x90   :  { %1145 = vmatpush.bf16.msrb.mxu0 %v1761_v21 }
  0x91   :  { %1159 = vmatpush.bf16.msrb.mxu1 %v1825_v27 }
  0x92   :  { %1173 = vmatpush.bf16.msrb.mxu2 %v1889_v28 }
  0x93   :  { %1187 = vmatpush.bf16.msrb.mxu3 %v1953_v29 }
  0x94   :  { %1146 = vmatpush.bf16.msrb.mxu0 %v1753_v33 }
  0x95   :  { %1160 = vmatpush.bf16.msrb.mxu1 %v1817_v43 }
  0x96   :  { %1174 = vmatpush.bf16.msrb.mxu2 %v1881_v44  ;;  %v2229_v44 = vld [vmem:[#allocation8 + $0x58] sm:$0xff] }
  0x97   :  { %1188 = vmatpush.bf16.msrb.mxu3 %v1945_v45  ;;  %v2228_v45 = vld [vmem:[#allocation8 + $0x50] sm:$0xff] }
  0x98   :  { %1147 = vmatpush.bf16.msrb.mxu0 %v1745_v49 }
  0x99   :  { %1161 = vmatpush.bf16.msrb.mxu1 %v1809_v53  ;;  %v2226_v53 = vld [vmem:[#allocation8 + $0x40] sm:$0xff] }
  0x9a   :  { %1175 = vmatpush.bf16.msrb.mxu2 %v1873_v54 }
  0x9b   :  { %1189 = vmatpush.bf16.msrb.mxu3 %v1937_v55  ;;  %1148 = vmatmul.bf16.vlgmr.msrb.gmra.mxu0 %v2499_v36 }
  0x9c   :  { %1162 = vmatmul.bf16.vlgmr.msrb.gmra.mxu1 %v2504_v41  ;;  %1342 = vmatpush.bf16.msra.mxu0 %v2225_v56  ;;  %v328_v41 = vperm.slane %v2520_v13, 0 }
  0x9d   :  { %1176 = vmatmul.bf16.vlgmr.msrb.gmra.mxu2 %v2501_v37  ;;  %v2219_v37 = vld [vmem:[#allocation8 + $0x8] sm:$0xff]  ;;  %1356 = vmatpush.bf16.msra.mxu1 %v2233_v14 }
  0x9e   :  { %1190 = vmatmul.bf16.vlgmr.msrb.gmra.mxu3 %v2506_v42 }
  0xa0   :  { %1343 = vmatpush.bf16.msra.mxu0 %v2224_v57 }
  0xa1   :  { %1357 = vmatpush.bf16.msra.mxu1 %v2232_v15  ;;  %v2241_v15 = vld [vmem:[#allocation10 + $0x38] sm:$0xff] }
  0xa2   :  { %1445 = vmatpush.bf16.msra.mxu2 %v2241_v15 }
  0xa4   :  { %1344 = vmatpush.bf16.msra.mxu0 %v2223_v58 }
  0xa5   :  { %1358 = vmatpush.bf16.msra.mxu1 %v2231_v31 }
  0xa8   :  { %1345 = vmatpush.bf16.msra.mxu0 %v2222_v59 }
  0xa9   :  { %1359 = vmatpush.bf16.msra.mxu1 %v2230_v34 }
  0xac   :  { %1346 = vmatpush.bf16.msra.mxu0 %v2221_v60 }
  0xad   :  { %1360 = vmatpush.bf16.msra.mxu1 %v2229_v44 }
  0xb0   :  { %1347 = vmatpush.bf16.msra.mxu0 %v2220_v61 }
  0xb1   :  { %1361 = vmatpush.bf16.msra.mxu1 %v2228_v45 }
  0xb4   :  { %1348 = vmatpush.bf16.msra.mxu0 %v2219_v37 }
  0xb5   :  { %1362 = vmatpush.bf16.msra.mxu1 %v2227_v52 }
  0xb8   :  { %1349 = vmatpush.bf16.msra.mxu0 %v2218_v20 }
  0xb9   :  { %1363 = vmatpush.bf16.msra.mxu1 %v2226_v53 }
  0xcc   :  { %v981_v36 = vpop.f32.mrf.mxu0 }
  0xcd   :  { %v982_v42 = vadd.f32 %v981_v36, %v328_v41 }
  0xcf   :  { %v995_v62 = vpop.f32.mrf.mxu1 }
  0xd0   :  { %v996_v0 = vadd.f32 %v995_v62, %v982_v42 }
  0xd3   :  { %v1009_v12 = vpop.f32.mrf.mxu2 }
  0xd4   :  { %v1023_v63 = vpop.f32.mrf.mxu3  ;;  %v983_v1 = vpop.f32.mrf.mxu0  ;;  %v1010_v3 = vadd.f32 %v1009_v12, %v996_v0 }
  0xd5   :  { %v984_v4 = vadd.f32 %v983_v1, %v328_v41 }
  0xd6   :  { %v1024_v6 = vadd.f32 %v1023_v63, %v1010_v3 }
  0xd7   :  { %v997_v2 = vpop.f32.mrf.mxu1 }
  0xd8   :  { %v998_v7 = vadd.f32 %v997_v2, %v984_v4 }
  0xdb   :  { %v1011_v5 = vpop.f32.mrf.mxu2 }
  0xdc   :  { %v1025_v8 = vpop.f32.mrf.mxu3  ;;  %v1012_v9 = vadd.f32 %v1011_v5, %v998_v7 }
  0xde   :  { %v1026_v16 = vadd.f32 %v1025_v8, %v1012_v9 }
  0xe4   :  { %v1037_v19 = vpop.f32.mrf.mxu0 }
  0xe5   :  { %v1038_v10 = vadd.f32 %v1037_v19, %v1024_v6 }
  0xe7   :  { %v1051_v11 = vpop.f32.mrf.mxu1 }
  0xe8   :  { %v1052_v17 = vadd.f32 %v1051_v11, %v1038_v10 }
  0xeb   :  { %v1065_v18 = vpop.f32.mrf.mxu2 }
  0xec   :  { %v1079_v21 = vpop.f32.mrf.mxu3  ;;  %v1039_v22 = vpop.f32.mrf.mxu0  ;;  %v1066_v23 = vadd.f32 %v1065_v18, %v1052_v17  ;;  %v2239_v17 = vld [vmem:[#allocation10 + $0x28] sm:$0xff]  ;;  %v2238_v18 = vld [vmem:[#allocation10 + $0x20] sm:$0xff] }
  0xed   :  { %v1040_v24 = vadd.f32 %v1039_v22, %v1026_v16  ;;  %v2240_v16 = vld [vmem:[#allocation10 + $0x30] sm:$0xff] }
  0xee   :  { %v1080_v26 = vadd.f32 %v1079_v21, %v1066_v23  ;;  %1446 = vmatpush.bf16.msra.mxu2 %v2240_v16  ;;  %v2237_v21 = vld [vmem:[#allocation10 + $0x18] sm:$0xff]  ;;  %v2236_v22 = vld [vmem:[#allocation10 + $0x10] sm:$0xff]  ;;  %v2235_v23 = vld [vmem:[#allocation10 + $0x8] sm:$0xff] }
  0xef   :  { %v1053_v25 = vpop.f32.mrf.mxu1 }
  0xf0   :  { %v1054_v27 = vadd.f32 %v1053_v25, %v1040_v24  ;;  %v1200_v32 = vmul.f32 0.01, %v1080_v26  ;;  %vm1196_vm0 = vcmp.gt.f32.partialorder %v1080_v26, 0.0  ;;  %v2234_v24 = vld [vmem:[#allocation10] sm:$0xff] }
  0xf2   :  { %v1204_v38 = vsel %vm1196_vm0, %v1080_v26, %v1200_v32  ;;  %1447 = vmatpush.bf16.msra.mxu2 %v2239_v17  ;;  %v2256_v26 = vld [vmem:[%s2537_s4] ss:$0 sm:$0xff] }
  0xf3   :  { %v1067_v28 = vpop.f32.mrf.mxu2 }
  0xf4   :  { %v1068_v29 = vadd.f32 %v1067_v28, %v1054_v27  ;;  %v1081_v30 = vpop.f32.mrf.mxu3 }
  0xf6   :  { %v1082_v33 = vadd.f32 %v1081_v30, %v1068_v29  ;;  %1448 = vmatpush.bf16.msra.mxu2 %v2238_v18 }
  0xf8   :  { %vm1198_vm1 = vcmp.gt.f32.partialorder %v1082_v33, 0.0  ;;  %v1202_v35 = vmul.f32 0.01, %v1082_v33  ;;  %v1093_v43 = vpop.f32.mrf.mxu0 }
  0xf9   :  { %v1107_v46 = vpop.f32.mrf.mxu1  ;;  %v1094_v50 = vadd.f32 %v1093_v43, %v329_v47  ;;  %v2257_v43 = vld [vmem:[%s2539_s6] ss:$0 sm:$0xff] }
  0xfa   :  { %v1206_v39 = vsel %vm1198_vm1, %v1082_v33, %v1202_v35  ;;  %1449 = vmatpush.bf16.msra.mxu2 %v2237_v21 }
  0xfb   :  { %v1208_v40 = vpack.c.bf16 %v1206_v39, %v1204_v38  ;;  %v1108_v54 = vadd.f32 %v1107_v46, %v1094_v50 }
  0xfd   :  { %1350 = vmatmul.bf16.vlgmr.msra.gmra.mxu0 %v1208_v40 }
  0xfe   :  { %1450 = vmatpush.bf16.msra.mxu2 %v2236_v22 }
 0x100   :  { %v1121_v48 = vpop.f32.mrf.mxu2  ;;  %v1095_v51 = vpop.f32.mrf.mxu0 }
 0x101   :  { %v1135_v49 = vpop.f32.mrf.mxu3  ;;  %v1109_v55 = vpop.f32.mrf.mxu1  ;;  %v1096_v56 = vadd.f32 %v1095_v51, %v329_v47  ;;  %v1122_v57 = vadd.f32 %v1121_v48, %v1108_v54 }
 0x102   :  { %1451 = vmatpush.bf16.msra.mxu2 %v2235_v23 }
 0x103   :  { %v1110_v61 = vadd.f32 %v1109_v55, %v1096_v56  ;;  %v1136_v36 = vadd.f32 %v1135_v49, %v1122_v57 }
 0x106   :  { %1452 = vmatpush.bf16.msra.mxu2 %v2234_v24 }
 0x108   :  { %v1123_v58 = vpop.f32.mrf.mxu2 }
 0x109   :  { %v1137_v59 = vpop.f32.mrf.mxu3  ;;  %v1124_v13 = vadd.f32 %v1123_v58, %v1110_v61 }
 0x10b   :  { %v1138_v12 = vadd.f32 %v1137_v59, %v1124_v13 }
 0x118   :  { %v1149_v60 = vpop.f32.mrf.mxu0 }
 0x119   :  { %v1163_v41 = vpop.f32.mrf.mxu1  ;;  %v1150_v62 = vadd.f32 %v1149_v60, %v1136_v36 }
 0x11b   :  { %v1164_v63 = vadd.f32 %v1163_v41, %v1150_v62 }
 0x120   :  { %v1177_v37 = vpop.f32.mrf.mxu2  ;;  %v1151_v20 = vpop.f32.mrf.mxu0 }
 0x121   :  { %v1191_v42 = vpop.f32.mrf.mxu3  ;;  %v1178_v0 = vadd.f32 %v1177_v37, %v1164_v63  ;;  %v1152_v1 = vadd.f32 %v1151_v20, %v1138_v12  ;;  %v1165_v2 = vpop.f32.mrf.mxu1 }
 0x123   :  { %v1192_v3 = vadd.f32 %v1191_v42, %v1178_v0  ;;  %v1166_v4 = vadd.f32 %v1165_v2, %v1152_v1 }
 0x125   :  { %v1201_v8 = vmul.f32 0.01, %v1192_v3  ;;  %vm1197_vm2 = vcmp.gt.f32.partialorder %v1192_v3, 0.0 }
 0x127   :  { %v1205_v10 = vsel %vm1197_vm2, %v1192_v3, %v1201_v8 }
 0x128   :  { %v1179_v5 = vpop.f32.mrf.mxu2 }
 0x129   :  { %v1180_v6 = vadd.f32 %v1179_v5, %v1166_v4  ;;  %v1193_v7 = vpop.f32.mrf.mxu3 }
 0x12b   :  { %v1194_v19 = vadd.f32 %v1193_v7, %v1180_v6 }
 0x12d   :  { %vm1199_vm3 = vcmp.gt.f32.partialorder %v1194_v19, 0.0  ;;  %v1203_v9 = vmul.f32 0.01, %v1194_v19 }
 0x12f   :  { %v1207_v11 = vsel %vm1199_vm3, %v1194_v19, %v1203_v9 }
 0x130   :  { %v1209_v14 = vpack.c.bf16 %v1207_v11, %v1205_v10 }
 0x132   :  { %1364 = vmatmul.bf16.vlgmr.msra.gmra.mxu1 %v1209_v14 }
 0x17a   :  { %v1351_v25 = vpop.f32.mrf.mxu0 }
 0x17b   :  { %v1352_v28 = vadd.f32 %v2256_v26, %v1351_v25 }
 0x182   :  { %v1353_v29 = vpop.f32.mrf.mxu0 }
 0x183   :  { %v1354_v31 = vadd.f32 %v2256_v26, %v1353_v29 }
 0x1af   :  { %v1365_v27 = vpop.f32.mrf.mxu1 }
 0x1b0   :  { %v1366_v30 = vadd.f32 %v1365_v27, %v1352_v28 }
 0x1b2   :  { %v1372_v33 = vmul.f32 0.01, %v1366_v30  ;;  %vm1370_vm4 = vcmp.gt.f32.partialorder %v1366_v30, 0.0 }
 0x1b4   :  { %v1374_v38 = vsel %vm1370_vm4, %v1366_v30, %v1372_v33 }
 0x1b7   :  { %v1367_v32 = vpop.f32.mrf.mxu1 }
 0x1b8   :  { %v1368_v34 = vadd.f32 %v1367_v32, %v1354_v31 }
 0x1ba   :  { %vm1371_vm5 = vcmp.gt.f32.partialorder %v1368_v34, 0.0  ;;  %v1373_v35 = vmul.f32 0.01, %v1368_v34 }
 0x1bc   :  { %v1375_v39 = vsel %vm1371_vm5, %v1368_v34, %v1373_v35 }
 0x1bd   :  { %v1376_v40 = vpack.c.bf16 %v1375_v39, %v1374_v38 }
 0x1bf   :  { %1453 = vmatmul.bf16.vlgmr.msra.gmra.mxu2 %v1376_v40 }
 0x242   :  { %v1454_v44 = vpop.f32.mrf.mxu2 }
 0x243   :  { %v1455_v45 = vadd.f32 %v2257_v43, %v1454_v44 }
 0x245   :  { %1459 = vst [vmem:[#allocation11] sm:$0xff] %v1455_v45 }
 0x24a   :  { %v1456_v46 = vpop.f32.mrf.mxu2 }
 0x24b   :  { %v1457_v47 = vadd.f32 %v2257_v43, %v1456_v46 }
 0x24d   :  { %1460 = vst [vmem:[#allocation11 + $0x8] sm:$0xff] %v1457_v47 }
 0x24e   :  { %1464 = vsyncadd [#allocation4], 224  ;;  %s1467_s9 = sshll.u32 %s2540_s7, 4  ;;  %s2421_s10 = smov [#allocation11]   ;;  %s1468_s9 = int_to_ptr.hbm [resolvable:$true] %s1467_s9 }
 0x24f   :  { %s1465_s11 = sshll.u32 %s2421_s10, 4  ;;  %s2422_s12 = smov 32   ;;  %s1466_s11 = int_to_ptr.vmem [resolvable:$true] %s1465_s11 }
 0x250   :  { %s2423_s13 = smov 2  }
 0x251   :  { %1473 = dma.vmem_to_hbm [thread:$0]  %s1466_s11, 32, %s1468_s9, [#allocation4], %s2422_s12, %s2422_s12, %s2423_s13  }
 0x252   :  { %2408 = dma.done.wait [#allocation4], 256  }
 0x253   :  { %2409 = vsyncadd [#allocation4], 4294967040 }
 0x254   :  { %1478 = vsyncpa [#allocation3], 1 }
 0x255   :  { %1479 = vsyncpa [#allocation6], 1 }
 0x256   :  { %1480 = vsyncpa [#allocation9], 1 }
 0x257   :  { %1481 = vsyncpa [#allocation4], 1 }

</bundles_post_ra>
